<compile_context>
chip_gen: v5e
topology: v5e:2x2
jax: 0.10.0
libtpu: 0.0.40
codegen_flags: <defaults>
</compile_context>

<pallas_src>
import jax
import jax.numpy as jnp
from jax.experimental import pallas as pl
from jax.experimental.pallas import tpu as pltpu


def _lr_kernel(x_ref, w_ref, o_ref, acc_ref):
    """One (tm, tk) x (n_out_pad, tk) -> (tm, n_out_pad) MXU step, accumulated over K."""
    k = pl.program_id(1)

    @pl.when(k == 0)
    def _init():
        acc_ref[...] = jnp.zeros_like(acc_ref)

    # Contract dim 1 of x (tm, tk) against dim 1 of w (n_out_pad, tk): x @ w.T,
    # i.e. the PyTorch Linear contraction, with no transpose materialized anywhere.
    acc_ref[...] += jax.lax.dot_general(
        x_ref[...],
        w_ref[...],
        dimension_numbers=(((1,), (1,)), ((), ())),
        preferred_element_type=jnp.float32,
    )

    @pl.when(k == pl.num_programs(1) - 1)
    def _store():
        o_ref[...] = acc_ref[...].astype(o_ref.dtype)


def _pick_k_tile(n_in, candidates=(1024, 512, 256, 128)):
    # K tiles must divide n_in exactly: a ragged last K block would feed unspecified
    # edge-padding into the reduction. Otherwise fall back to a single full-K block.
    for tk in candidates:
        if n_in % tk == 0:
            return tk
    return n_in


def lr_forward(x, weight, *, tm=256):
    """Forward pass of LR: x @ weight.T (weight in PyTorch (n_out, n_in) layout)."""
    batch, n_in = x.shape
    n_out, n_in_w = weight.shape
    assert n_in_w == n_in, "weight must be (n_out, n_in)"

    # Lane-dense output: pad n_out up to a multiple of 128 with zero weight rows.
    # Padded output columns are exactly zero and are sliced off below.
    n_out_pad = pl.cdiv(n_out, 128) * 128
    if n_out_pad != n_out:
        weight = jnp.pad(weight, ((0, n_out_pad - n_out), (0, 0)))

    tm = min(tm, batch)          # block = full batch dim when batch is small
    tk = _pick_k_tile(n_in)
    grid_m = pl.cdiv(batch, tm)
    grid_k = n_in // tk

    out_dtype = x.dtype
    cost = pl.CostEstimate(
        flops=2 * batch * n_in * n_out_pad,
        transcendentals=0,
        bytes_accessed=(
            x.size * x.dtype.itemsize
            + weight.size * weight.dtype.itemsize * grid_m
            + batch * n_out_pad * jnp.dtype(out_dtype).itemsize
        ),
    )

    y_pad = pl.pallas_call(
        _lr_kernel,
        out_shape=jax.ShapeDtypeStruct((batch, n_out_pad), out_dtype),
        grid=(grid_m, grid_k),
        in_specs=[
            pl.BlockSpec((tm, tk), lambda i, k: (i, k)),           # x tile
            pl.BlockSpec((n_out_pad, tk), lambda i, k: (0, k)),    # weight, untransposed
        ],
        out_specs=pl.BlockSpec((tm, n_out_pad), lambda i, k: (i, 0)),
        scratch_shapes=[pltpu.VMEM((tm, n_out_pad), jnp.float32)],
        compiler_params=pltpu.CompilerParams(
            dimension_semantics=("parallel", "arbitrary"),
            vmem_limit_bytes=32 * 1024 * 1024,
        ),
        cost_estimate=cost,
    )(x, weight)

    return y_pad[:, :n_out] if n_out_pad != n_out else y_pad


if __name__ == "__main__":
    # Small shapes consistent with the module: batch=8, n_in=32, n_out=16.
    batch, n_in, n_out = 8, 32, 16

    key = jax.random.PRNGKey(0)
    kx, kw = jax.random.split(key)

    x = jax.random.normal(kx, (batch, n_in), dtype=jnp.float32)
    # Deterministic init mimicking nn.Linear's uniform(-1/sqrt(n_in), 1/sqrt(n_in)).
    bound = 1.0 / (n_in ** 0.5)
    weight = jax.random.uniform(
        kw, (n_out, n_in), dtype=jnp.float32, minval=-bound, maxval=bound
    )

    y = jax.block_until_ready(lr_forward(x, weight))

    # Sanity check against plain JAX reference.
    y_ref = x @ weight.T
    assert y.shape == (batch, n_out)
    assert jnp.allclose(y, y_ref, atol=1e-5, rtol=1e-5), float(
        jnp.max(jnp.abs(y - y_ref))
    )

    print("KERNEL_OK")
</pallas_src>

<mosaic_0001>
module attributes {stable_mosaic.version = 11 : i64} {
  func.func @_lr_kernel(%arg0: i32, %arg1: i32, %arg2: memref<8x32xf32, #tpu.memory_space<vmem>>, %arg3: memref<128x32xf32, #tpu.memory_space<vmem>>, %arg4: memref<8x128xf32, #tpu.memory_space<vmem>>, %arg5: memref<8x128xf32, #tpu.memory_space<vmem>>) attributes {dimension_semantics = [#tpu.dimension_semantics<parallel>, #tpu.dimension_semantics<arbitrary>], iteration_bounds = array<i64: 1, 1>, scalar_prefetch = 0 : i64, scratch_operands = 1 : i64, tpu.core_type = #tpu.core_type<tc>, window_params = [{transform_indices = @transform_0, window_bounds = array<i64: 8, 32>}, {transform_indices = @transform_1, window_bounds = array<i64: 128, 32>}, {transform_indices = @transform_2, window_bounds = array<i64: 8, 128>}]} {
    %c0_i32 = arith.constant 0 : i32
    %0 = arith.cmpi eq, %arg1, %c0_i32 : i32
    %1 = arith.extui %0 : i1 to i32
    %c0_i32_0 = arith.constant 0 : i32
    %2 = arith.cmpi ne, %1, %c0_i32_0 : i32
    scf.if %2 {
      %cst_10 = arith.constant 0.000000e+00 : f32
      %12 = vector.broadcast %cst_10 : f32 to vector<8x128xf32>
      %c0_11 = arith.constant 0 : index
      %c0_12 = arith.constant 0 : index
      %13 = vector.load %arg5[%c0_11, %c0_12] : memref<8x128xf32, #tpu.memory_space<vmem>>, vector<8x128xf32>
      tpu.vector_store %arg5[%c0_11, %c0_12], %12 {strides = array<i32>} : memref<8x128xf32, #tpu.memory_space<vmem>>, vector<8x128xf32>,
    } else {
    }
    %c0 = arith.constant 0 : index
    %c0_1 = arith.constant 0 : index
    %3 = vector.load %arg5[%c0, %c0_1] : memref<8x128xf32, #tpu.memory_space<vmem>>, vector<8x128xf32>
    %c0_2 = arith.constant 0 : index
    %c0_3 = arith.constant 0 : index
    %4 = vector.load %arg2[%c0_2, %c0_3] : memref<8x32xf32, #tpu.memory_space<vmem>>, vector<8x32xf32>
    %c0_4 = arith.constant 0 : index
    %c0_5 = arith.constant 0 : index
    %5 = vector.load %arg3[%c0_4, %c0_5] : memref<128x32xf32, #tpu.memory_space<vmem>>, vector<128x32xf32>
    %cst = arith.constant dense<0.000000e+00> : vector<8x128xf32>
    %6 = tpu.matmul %4, %5, %cst {dimension_numbers = #tpu.dot_dimension_numbers<[1], [1], [0], [0], [0, 0, 1, 0], [], []>} : vector<8x32xf32>, vector<128x32xf32>, vector<8x128xf32> -> vector<8x128xf32>
    %7 = arith.addf %3, %6 : vector<8x128xf32>
    %c0_6 = arith.constant 0 : index
    %c0_7 = arith.constant 0 : index
    %8 = vector.load %arg5[%c0_6, %c0_7] : memref<8x128xf32, #tpu.memory_space<vmem>>, vector<8x128xf32>
    tpu.vector_store %arg5[%c0_6, %c0_7], %7 {strides = array<i32>} : memref<8x128xf32, #tpu.memory_space<vmem>>, vector<8x128xf32>,
    %c0_i32_8 = arith.constant 0 : i32
    %9 = arith.cmpi eq, %arg1, %c0_i32_8 : i32
    %10 = arith.extui %9 : i1 to i32
    %c0_i32_9 = arith.constant 0 : i32
    %11 = arith.cmpi ne, %10, %c0_i32_9 : i32
    scf.if %11 {
      %c0_10 = arith.constant 0 : index
      %c0_11 = arith.constant 0 : index
      %12 = vector.load %arg5[%c0_10, %c0_11] : memref<8x128xf32, #tpu.memory_space<vmem>>, vector<8x128xf32>
      %c0_12 = arith.constant 0 : index
      %c0_13 = arith.constant 0 : index
      %13 = vector.load %arg4[%c0_12, %c0_13] : memref<8x128xf32, #tpu.memory_space<vmem>>, vector<8x128xf32>
      tpu.vector_store %arg4[%c0_12, %c0_13], %12 {strides = array<i32>} : memref<8x128xf32, #tpu.memory_space<vmem>>, vector<8x128xf32>,
    } else {
    }
    return
  }
  func.func @transform_0(%arg0: i32, %arg1: i32) -> (i32, i32) {
    %c0_i32 = arith.constant 0 : i32
    return %arg0, %arg1 : i32, i32
  }
  func.func @transform_1(%arg0: i32, %arg1: i32) -> (i32, i32) {
    %c0_i32 = arith.constant 0 : i32
    %c0_i32_0 = arith.constant 0 : i32
    return %c0_i32, %arg1 : i32, i32
  }
  func.func @transform_2(%arg0: i32, %arg1: i32) -> (i32, i32) {
    %c0_i32 = arith.constant 0 : i32
    %c0_i32_0 = arith.constant 0 : i32
    return %arg0, %c0_i32 : i32, i32
  }
}

</mosaic_0001>

<bundles_post_ra>
// kernel: tpu_custom_call.1
= control target key start
LH: loop header
LB: loop body
LE: loop exit
PB: predicated region body
PF: predicated region fallthrough
CT: control target
= control target key end

     0   :  { %vm35_vm0 = vcmask 261120   ;;  %s261_s0 = inlined_call_operand.vmem [shape: f32[8,32], index: 0, kind: input, shape index: {}]   ;;  %s262_s1 = inlined_call_operand.vmem [shape: f32[128,32], index: 1, kind: input, shape index: {}]   ;;  %s263_s2 = inlined_call_operand.hbm [shape: f32[8,128], index: 2, kind: output, shape index: {}]  }
   0x1   :  { %v34_v0 = vld [vmem:[%s262_s1 + $0x78] sm:$0xff]  ;;  %v33_v1 = vld [vmem:[%s262_s1 + $0x70] sm:$0xff] }
   0x2   :  { %130 = vmatpush.xpose.msk.msra.mxu0 %vm35_vm0, %v34_v0 }
   0x3   :  { %7 = vsyncpa [#allocation4], 0  ;;  %v32_v2 = vld [vmem:[%s262_s1 + $0x68] sm:$0xff]  ;;  %v31_v3 = vld [vmem:[%s262_s1 + $0x60] sm:$0xff]  ;;  %s174_s15 = smov [#allocation3]   ;;  %s121_s19 = sshll.u32 %s263_s2, 4  ;;  %s122_s19 = int_to_ptr.hbm [resolvable:$true] %s121_s19 }
   0x4   :  { %v30_v4 = vld [vmem:[%s262_s1 + $0x58] sm:$0xff]  ;;  %v29_v5 = vld [vmem:[%s262_s1 + $0x50] sm:$0xff]  ;;  %v28_v6 = vld [vmem:[%s262_s1 + $0x48] sm:$0xff]  ;;  %s119_s16 = sshll.u32 %s174_s15, 4  ;;  %s120_s16 = int_to_ptr.vmem [resolvable:$true] %s119_s16 }
   0x5   :  { %v27_v7 = vld [vmem:[%s262_s1 + $0x40] sm:$0xff]  ;;  %v26_v8 = vld [vmem:[%s262_s1 + $0x38] sm:$0xff]  ;;  %v25_v9 = vld [vmem:[%s262_s1 + $0x30] sm:$0xff] }
   0x6   :  { %131 = vmatpush.xpose.msk.msra.mxu0 %vm35_vm0, %v33_v1  ;;  %v24_v10 = vld [vmem:[%s262_s1 + $0x28] sm:$0xff]  ;;  %v23_v11 = vld [vmem:[%s262_s1 + $0x20] sm:$0xff]  ;;  %v22_v12 = vld [vmem:[%s262_s1 + $0x18] sm:$0xff] }
   0x7   :  { %v21_v13 = vld [vmem:[%s262_s1 + $0x10] sm:$0xff]  ;;  %v20_v14 = vld [vmem:[%s262_s1 + $0x8] sm:$0xff]  ;;  %v19_v15 = vld [vmem:[%s262_s1] sm:$0xff] }
   0x8   :  { %v18_v16 = vld [vmem:[%s261_s0] sm:$0xff] }
   0xa   :  { %132 = vmatpush.xpose.msk.msra.mxu0 %vm35_vm0, %v32_v2 }
   0xe   :  { %133 = vmatpush.xpose.msk.msra.mxu0 %vm35_vm0, %v31_v3 }
  0x12   :  { %134 = vmatpush.xpose.msk.msra.mxu0 %vm35_vm0, %v30_v4 }
  0x16   :  { %135 = vmatpush.xpose.msk.msra.mxu0 %vm35_vm0, %v29_v5 }
  0x1a   :  { %136 = vmatpush.xpose.msk.msra.mxu0 %vm35_vm0, %v28_v6 }
  0x1e   :  { %137 = vmatpush.xpose.msk.msra.mxu0 %vm35_vm0, %v27_v7 }
  0x22   :  { %138 = vmatpush.xpose.msk.msra.mxu0 %vm35_vm0, %v26_v8 }
  0x26   :  { %139 = vmatpush.xpose.msk.msra.mxu0 %vm35_vm0, %v25_v9 }
  0x2a   :  { %140 = vmatpush.xpose.msk.msra.mxu0 %vm35_vm0, %v24_v10 }
  0x2e   :  { %141 = vmatpush.xpose.msk.msra.mxu0 %vm35_vm0, %v23_v11 }
  0x32   :  { %142 = vmatpush.xpose.msk.msra.mxu0 %vm35_vm0, %v22_v12 }
  0x36   :  { %143 = vmatpush.xpose.msk.msra.mxu0 %vm35_vm0, %v21_v13 }
  0x3a   :  { %144 = vmatpush.xpose.msk.msra.mxu0 %vm35_vm0, %v20_v14 }
  0x3e   :  { %145 = vmatpush.xpose.msk.msra.mxu0 %vm35_vm0, %v19_v15 }
  0x41   :  { %146 = vmatmul.msk.f32.vlgmr.msra.gmra.mxu0 %vm35_vm0, %v18_v16 }
  0xbe   :  { %v104_v17 = vpop.f32.mrf.mxu0 }
  0xbf   :  { %113 = vst [vmem:[#allocation3] sm:$0xff] %v104_v17 }
  0xc0   :  { %124 = dma.vmem_to_hbm [thread:$0]  %s120_s16, 128, %s122_s19, [#allocation4]  }
  0xc1   :  { %172 = dma.done.wait [#allocation4], 128  }
  0xc2   :  { %173 = vsyncadd [#allocation4], 4294967168 }
  0xc3   :  { %129 = vsyncpa [#allocation4], 1 }

</bundles_post_ra>
